<compile_context>
chip_gen: v7x
topology: tpu7x:2x2x1
jax: 0.10.0
libtpu: 0.0.40
codegen_flags: <defaults>
</compile_context>

<pallas_src>
import jax
import jax.numpy as jnp
from jax.experimental import pallas as pl
from jax.experimental.pallas import tpu as pltpu


def _make_kernel(nt, tq):
    """Build the kernel for a given (static) tile count / tile size."""

    def kernel(x_ref, wb_ref, o_ref, proj_sc):
        # x_ref : (Cin, P)      pixels, channels-first, lane axis = P
        # wb_ref: (R, Cin+1)    packed [weights | bias-column], R = 2*Cout+Cin+1
        # o_ref : (Cin, TQ)     output tile
        # proj_sc: (R, P) f32   per-batch projections (K | Q | WlV+b, +ones row)
        cin = o_ref.shape[0]
        r = wb_ref.shape[0]
        cout = (r - cin - 1) // 2

        def project():
            wb = wb_ref[...]                                  # (R, Cin+1)
            proj_sc[...] = (
                jnp.dot(wb[:, :cin], x_ref[...],
                        preferred_element_type=jnp.float32)   # (R, P)
                + wb[:, cin:]                                 # bias column
            )

        if nt == 1:
            project()
        else:
            @pl.when(pl.program_id(1) == 0)                   # once per batch
            def _():
                project()

        proj = proj_sc[...]                                   # (R, P)
        q = proj[cout:2 * cout]                               # (Cout, P)
        wvb = proj[2 * cout:]                                 # (Cin+1, P), last row == 1

        if nt == 1:
            k = proj[:cout]                                   # (Cout, TQ==P)
            x_q = x_ref[...]                                  # (Cin, TQ==P)
        else:
            start = pl.multiple_of(pl.program_id(1) * tq, 128)
            k = proj_sc[:cout, pl.ds(start, tq)]              # (Cout, TQ)
            x_q = x_ref[:, pl.ds(start, tq)]                  # (Cin, TQ)

        # Attention logits for this query tile: s[i, j] = sum_c K[c,i] * Q[c,j].
        s = jnp.einsum("ci,cj->ij", k, q,
                       preferred_element_type=jnp.float32)    # (TQ, P) f32
        m = jnp.max(s, axis=-1, keepdims=True)
        e = jnp.exp(s - m)                                    # (TQ, P)

        # u[c, i] = sum_j wvb[c, j] * e[i, j] -> numerators + (last row) denoms.
        u = jnp.einsum("cj,ij->ci", wvb, e,
                       preferred_element_type=jnp.float32)    # (Cin+1, TQ)
        num = u[:cin]                                         # (Cin, TQ)
        den = u[cin:cin + 1]                                  # (1, TQ)
        o_ref[...] = x_q + num / den                          # exact divide

    return kernel


def space_attention(x_nchw, params, *, tq=256):
    """x_nchw: (B, Cin, H, W) float32.  Returns (B, Cin, H, W).

    tq: query-tile size used only when P = H*W is large; use 256 on v6e/v7x,
    128 on v5e.  For small P the grid collapses to one tile per batch.
    """
    B, Cin, H, W = x_nchw.shape
    P = H * W
    Cout = params["wk"].shape[0]          # torch Conv2d layout: (Cout, Cin)

    # Adaptive query tiling (perf review): collapse the grid for small P.
    if P <= 1024 or tq % 128 != 0 or P % tq != 0:
        TQ = P
        # TODO(synk): pad P to a multiple of 128 + masked / online-softmax key
        # tiling for very large or non-128-multiple spatial sizes.
    else:
        TQ = tq
    nt = P // TQ

    # Channels-first tokens: pure reshape, no transpose; lane axis = P.
    x_tok = x_nchw.reshape(B, Cin, P)

    # ---- Pack every weight / bias into a single operand --------------------
    # Fold local_weight through V: Wl(Wv x + bv) + bl = (Wl Wv) x + (Wl bv + bl)
    wlv = params["wl"] @ params["wv"]                              # (Cin, Cin)
    blv = params["wl"] @ params["bv"] + params["bl"]               # (Cin,)
    # Extra zeros/ones row so the attention matmul also yields softmax row-sums.
    wlv_aug = jnp.concatenate([wlv, jnp.zeros((1, Cin), jnp.float32)], axis=0)
    blv_aug = jnp.concatenate([blv, jnp.ones((1,), jnp.float32)], axis=0)
    w_rows = jnp.concatenate([params["wk"], params["wq"], wlv_aug], axis=0)  # (R, Cin)
    b_rows = jnp.concatenate([params["bk"], params["bq"], blv_aug], axis=0)  # (R,)
    wb = jnp.concatenate([w_rows, b_rows[:, None]], axis=1)                  # (R, Cin+1)
    R = wb.shape[0]                                                          # 2*Cout+Cin+1

    cost = pl.CostEstimate(
        flops=2 * B * (R * Cin * P + (Cout + Cin + 1) * P * P),
        transcendentals=B * P * P,
        bytes_accessed=4 * (2 * B * Cin * P + R * (Cin + 1)),
    )

    out_tok = pl.pallas_call(
        _make_kernel(nt, TQ),
        out_shape=jax.ShapeDtypeStruct((B, Cin, P), jnp.float32),
        grid_spec=pltpu.PrefetchScalarGridSpec(
            num_scalar_prefetch=0,
            grid=(B, nt),
            in_specs=[
                # Single x stream; block constant over t -> resident across tiles.
                pl.BlockSpec((None, Cin, P), lambda b, t: (b, 0, 0)),
                # Packed weights+biases; block == full array -> resident.
                pl.BlockSpec((R, Cin + 1), lambda b, t: (0, 0)),
            ],
            out_specs=pl.BlockSpec((None, Cin, TQ), lambda b, t: (b, 0, t)),
            scratch_shapes=[pltpu.VMEM((R, P), jnp.float32)],
        ),
        compiler_params=pltpu.CompilerParams(
            dimension_semantics=("parallel", "arbitrary")),
        cost_estimate=cost,
    )(x_tok, wb)

    return out_tok.reshape(B, Cin, H, W)


def _reference(x_nchw, params):
    """Pure-JAX f32 reference mirroring the PyTorch forward (kernel_size=1, stride=1)."""
    B, Cin, H, W = x_nchw.shape
    P = H * W
    x = x_nchw.reshape(B, Cin, P)
    K = jnp.einsum("oc,bcp->bop", params["wk"], x) + params["bk"][None, :, None]
    Q = jnp.einsum("oc,bcp->bop", params["wq"], x) + params["bq"][None, :, None]
    V = jnp.einsum("oc,bcp->bop", params["wv"], x) + params["bv"][None, :, None]
    KQ = jnp.einsum("bci,bcj->bij", K, Q)
    att = jax.nn.softmax(KQ, axis=-1)
    O = jnp.einsum("bij,bcj->bci", att, V)                      # (B, Cout, P)
    Wc = jnp.einsum("ic,bcp->bip", params["wl"], O) + params["bl"][None, :, None]
    return (x + Wc).reshape(B, Cin, H, W)


def init_params(key, input_size, output_size):
    """Weights in torch Conv2d layout: (Cout, Cin) / (Cout,) (1x1 kernels squeezed)."""
    ks = jax.random.split(key, 8)
    s = 0.1
    return {
        "wk": jax.random.normal(ks[0], (output_size, input_size), jnp.float32) * s,
        "bk": jax.random.normal(ks[1], (output_size,), jnp.float32) * s,
        "wq": jax.random.normal(ks[2], (output_size, input_size), jnp.float32) * s,
        "bq": jax.random.normal(ks[3], (output_size,), jnp.float32) * s,
        "wv": jax.random.normal(ks[4], (output_size, input_size), jnp.float32) * s,
        "bv": jax.random.normal(ks[5], (output_size,), jnp.float32) * s,
        "wl": jax.random.normal(ks[6], (input_size, output_size), jnp.float32) * s,
        "bl": jax.random.normal(ks[7], (input_size,), jnp.float32) * s,
    }


if __name__ == "__main__":
    # Module config: input_size=4, output_size=8, kernel_size=1, stride=1,
    # padding=0, scale=1 (pool branch inactive since stride == 1).
    B, Cin, H, W = 2, 4, 16, 16
    Cout = 8

    key = jax.random.PRNGKey(0)
    kx, kp = jax.random.split(key)
    x = jax.random.normal(kx, (B, Cin, H, W), jnp.float32)
    params = init_params(kp, Cin, Cout)

    out = jax.block_until_ready(space_attention(x, params))

    ref = _reference(x, params)
    assert out.shape == (B, Cin, H, W)
    # All-f32 kernel compute + exact divide; only f32 rounding / weight-folding
    # order differences remain.
    assert jnp.allclose(out, ref, atol=2e-3, rtol=2e-3), "mismatch vs JAX reference"

    print("KERNEL_OK")
</pallas_src>

<mosaic_0001>
module attributes {stable_mosaic.version = 11 : i64} {
  func.func @kernel(%arg0: i32, %arg1: i32, %arg2: memref<1x4x256xf32, #tpu.memory_space<vmem>>, %arg3: memref<21x5xf32, #tpu.memory_space<vmem>>, %arg4: memref<1x4x256xf32, #tpu.memory_space<vmem>>, %arg5: memref<21x256xf32, #tpu.memory_space<vmem>>) attributes {dimension_semantics = [#tpu.dimension_semantics<parallel>, #tpu.dimension_semantics<arbitrary>], iteration_bounds = array<i64: 2, 1>, scalar_prefetch = 0 : i64, scratch_operands = 1 : i64, tpu.core_type = #tpu.core_type<tc>, window_params = [{transform_indices = @transform_0, window_bounds = array<i64: 1, 4, 256>}, {pipeline_mode = #tpu.pipeline_mode<synchronous>, transform_indices = @transform_1, window_bounds = array<i64: 21, 5>}, {transform_indices = @transform_2, window_bounds = array<i64: 1, 4, 256>}]} {
    %c0 = arith.constant 0 : index
    %c0_0 = arith.constant 0 : index
    %0 = vector.load %arg3[%c0, %c0_0] : memref<21x5xf32, #tpu.memory_space<vmem>>, vector<21x5xf32>
    %1 = vector.extract_strided_slice %0 {offsets = [0, 0], sizes = [21, 4], strides = [1, 1]} : vector<21x5xf32> to vector<21x4xf32>
    %c0_1 = arith.constant 0 : index
    %c0_2 = arith.constant 0 : index
    %c0_3 = arith.constant 0 : index
    %2 = vector.load %arg2[%c0_1, %c0_2, %c0_3] : memref<1x4x256xf32, #tpu.memory_space<vmem>>, vector<1x4x256xf32>
    %3 = vector.shape_cast %2 : vector<1x4x256xf32> to vector<4x256xf32>
    %cst = arith.constant dense<0.000000e+00> : vector<21x256xf32>
    %4 = tpu.matmul %1, %3, %cst {dimension_numbers = #tpu.dot_dimension_numbers<[1], [0], [0], [1], [0, 0, 1, 1], [], []>} : vector<21x4xf32>, vector<4x256xf32>, vector<21x256xf32> -> vector<21x256xf32>
    %5 = vector.extract_strided_slice %0 {offsets = [0, 4], sizes = [21, 1], strides = [1, 1]} : vector<21x5xf32> to vector<21x1xf32>
    %6 = vector.broadcast %5 : vector<21x1xf32> to vector<21x256xf32>
    %7 = arith.addf %4, %6 : vector<21x256xf32>
    %c0_4 = arith.constant 0 : index
    %c0_5 = arith.constant 0 : index
    %8 = vector.load %arg5[%c0_4, %c0_5] : memref<21x256xf32, #tpu.memory_space<vmem>>, vector<21x256xf32>
    tpu.vector_store %arg5[%c0_4, %c0_5], %7 {strides = array<i32>} : memref<21x256xf32, #tpu.memory_space<vmem>>, vector<21x256xf32>,
    %c0_6 = arith.constant 0 : index
    %c0_7 = arith.constant 0 : index
    %9 = vector.load %arg5[%c0_6, %c0_7] : memref<21x256xf32, #tpu.memory_space<vmem>>, vector<21x256xf32>
    %10 = vector.extract_strided_slice %9 {offsets = [8, 0], sizes = [8, 256], strides = [1, 1]} : vector<21x256xf32> to vector<8x256xf32>
    %11 = vector.extract_strided_slice %9 {offsets = [16, 0], sizes = [5, 256], strides = [1, 1]} : vector<21x256xf32> to vector<5x256xf32>
    %12 = vector.extract_strided_slice %9 {offsets = [0, 0], sizes = [8, 256], strides = [1, 1]} : vector<21x256xf32> to vector<8x256xf32>
    %c0_8 = arith.constant 0 : index
    %c0_9 = arith.constant 0 : index
    %c0_10 = arith.constant 0 : index
    %13 = vector.load %arg2[%c0_8, %c0_9, %c0_10] : memref<1x4x256xf32, #tpu.memory_space<vmem>>, vector<1x4x256xf32>
    %14 = vector.shape_cast %13 : vector<1x4x256xf32> to vector<4x256xf32>
    "tpu.trace_start"() <{level = 10 : i32, message = "ci,cj->ij"}> : () -> ()
    %cst_11 = arith.constant dense<0.000000e+00> : vector<256x256xf32>
    %15 = tpu.matmul %12, %10, %cst_11 {dimension_numbers = #tpu.dot_dimension_numbers<[0], [0], [1], [1], [0, 1, 1, 1], [], []>} : vector<8x256xf32>, vector<8x256xf32>, vector<256x256xf32> -> vector<256x256xf32>
    "tpu.trace_stop"() : () -> ()
    %cst_12 = arith.constant dense<0xFF800000> : vector<256xf32>
    %16 = vector.multi_reduction <maximumf>, %15, %cst_12 [1] : vector<256x256xf32> to vector<256xf32>
    %17 = vector.shape_cast %16 : vector<256xf32> to vector<256x1xf32>
    %18 = vector.broadcast %17 : vector<256x1xf32> to vector<256x256xf32>
    %19 = arith.subf %15, %18 : vector<256x256xf32>
    %20 = math.exp %19 : vector<256x256xf32>
    "tpu.trace_start"() <{level = 10 : i32, message = "cj,ij->ci"}> : () -> ()
    %cst_13 = arith.constant dense<0.000000e+00> : vector<5x256xf32>
    %21 = tpu.matmul %11, %20, %cst_13 {dimension_numbers = #tpu.dot_dimension_numbers<[1], [1], [0], [0], [0, 0, 1, 0], [], []>} : vector<5x256xf32>, vector<256x256xf32>, vector<5x256xf32> -> vector<5x256xf32>
    "tpu.trace_stop"() : () -> ()
    %22 = vector.extract_strided_slice %21 {offsets = [0, 0], sizes = [4, 256], strides = [1, 1]} : vector<5x256xf32> to vector<4x256xf32>
    %23 = vector.extract_strided_slice %21 {offsets = [4, 0], sizes = [1, 256], strides = [1, 1]} : vector<5x256xf32> to vector<1x256xf32>
    %24 = vector.broadcast %23 : vector<1x256xf32> to vector<4x256xf32>
    %25 = arith.divf %22, %24 : vector<4x256xf32>
    %26 = arith.addf %14, %25 : vector<4x256xf32>
    %c0_14 = arith.constant 0 : index
    %c0_15 = arith.constant 0 : index
    %c0_16 = arith.constant 0 : index
    %27 = vector.load %arg4[%c0_14, %c0_15, %c0_16] : memref<1x4x256xf32, #tpu.memory_space<vmem>>, vector<1x4x256xf32>
    %28 = vector.shape_cast %27 : vector<1x4x256xf32> to vector<4x256xf32>
    %29 = vector.shape_cast %26 : vector<4x256xf32> to vector<1x4x256xf32>
    tpu.vector_store %arg4[%c0_14, %c0_15, %c0_16], %29 {strides = array<i32>} : memref<1x4x256xf32, #tpu.memory_space<vmem>>, vector<1x4x256xf32>,
    return
  }
  func.func @transform_0(%arg0: i32, %arg1: i32) -> (i32, i32, i32) {
    %c0_i32 = arith.constant 0 : i32
    %c0_i32_0 = arith.constant 0 : i32
    %c0_i32_1 = arith.constant 0 : i32
    return %arg0, %c0_i32, %c0_i32_0 : i32, i32, i32
  }
  func.func @transform_1(%arg0: i32, %arg1: i32) -> (i32, i32) {
    %c0_i32 = arith.constant 0 : i32
    %c0_i32_0 = arith.constant 0 : i32
    %c0_i32_1 = arith.constant 0 : i32
    return %c0_i32, %c0_i32_0 : i32, i32
  }
  func.func @transform_2(%arg0: i32, %arg1: i32) -> (i32, i32, i32) {
    %c0_i32 = arith.constant 0 : i32
    %c0_i32_0 = arith.constant 0 : i32
    return %arg0, %c0_i32, %arg1 : i32, i32, i32
  }
}

</mosaic_0001>

<bundles_post_ra>
// kernel: tpu_custom_call.1
= control target key start
LH: loop header
LB: loop body
LE: loop exit
PB: predicated region body
PF: predicated region fallthrough
CT: control target
= control target key end

     0   :  { %7 = vsyncpa [#allocation4], 0  ;;  %s2035_s0 = inlined_call_operand.vmem [shape: f32[2,4,256], index: 0, kind: input, shape index: {}]   ;;  %s2036_s1 = inlined_call_operand.vmem [shape: f32[21,5], index: 1, kind: input, shape index: {}]   ;;  %s2037_s2 = inlined_call_operand.hbm [shape: f32[2,4,256], index: 2, kind: output, shape index: {}]  }
   0x1   :  { %9 = vsyncpa [#allocation4 + $0x1], 0  ;;  %s1574_s9 = smov 0   ;;  %s1576_s10 = smov 0  }
   0x2   :  { %s1578_s11 = smov 0   ;;  %s1580_s12 = smov 0  }
   0x3   :  { %s1582_s13 = smov 0   ;;  %s1584_s14 = smov 0  }
   0x4 LB: > { %s1168_s15 = sadd.s32 4294967295, %s1554_s14   ;;  %s1169_s16 = sadd.s32 4294967294, %s1554_s14   ;;  %s1554_s14 = sphi %s1584_s14, %s15_s14   ;;  %s1550_s13 = sphi %s1582_s13, %s2085_s13   ;;  %s1546_s12 = sphi %s1580_s12, %s2084_s12   ;;  %s1542_s11 = sphi %s1578_s11, %s2083_s11   ;;  %s1538_s10 = sphi %s1576_s10, %s2082_s10   ;;  %s1534_s9 = sphi %s1574_s9, %s2081_s9  }
   0x5   : > { %s27_s17 = sadd.s32 1, %s1550_s13  ;;  %s83_s18 = sadd.s32 1, %s1542_s11 }
   0x6   : > { %p29_p0 = scmp.ge.s32.totalorder %s27_s17, 2  ;;  %p93_p1 = scmp.ne.s32.totalorder %s1542_s11, %s1538_s10 }
   0x7   : > { %p94_p2 = scmp.eq.s32.totalorder %s1168_s15, 1  ;;  %p99_p3 = scmp.ne.s32.totalorder %s1538_s10, %s1534_s9 }
   0x8   : > { %s2087_s17 = smov (%p29_p0, %s27_s17), 0  ;;  %p100_p5 = scmp.eq.s32.totalorder %s1169_s16, 1 }
   0x9   : > { %p1614_p4 = por %p94_p2, %p93_p1  ;;  %s78_s20 = ssub.s32 %s1550_s13, %s2087_s17 }
   0xa   : > { %p1172_p6 = scmp.ge.s32.totalorder %s1554_s14, 1  ;;  %p81_p7 = scmp.eq.s32.totalorder %s78_s20, 0 }
   0xb   : > { %p1621_p8 = por %p100_p5, %p99_p3  ;;  %p129_p9 = scmp.lt.s32.totalorder %s1554_s14, 3 }
   0xc   : > { %s1627_s22 = scalar_select %p81_p7, %s1542_s11, %s83_s18  }
   0xd   : > { %p130_p10 = pnand %p1172_p6, %p129_p9 }
   0xf   : > { %133 = sbr.rel (%p130_p10) target bundleno = 1129 (0x469), region = 28 }
  0x16   : > { %p151_p11 = scmp.lt.s32.totalorder %s1546_s12, 1  ;;  %v1556_v0 = vmov 0.0   ;;  %v157_v1 = vld [vmem:[%s2036_s1] sm:$0xff]  ;;  %v1557_v2 = vmov 4   ;;  %vm185_vm0 = vcmask 1043456   ;;  %v158_v4 = vld [vmem:[%s2036_s1 + $0x8] sm:$0xff] }
  0x17   : > { %254 = vmatprep.mubr.f32.mxu0 %v1556_v0  ;;  %511 = vmatprep.mubr.f32.mxu1 %v1556_v0  ;;  %vm178_vm1 = vcmask 31744   ;;  %vm350_vm2 = vcmask 64512   ;;  %v1715_v48 = vld [vmem:[%s2036_s1 + $0x10] sm:$0x1f]  ;;  %s148_s6 = sand.u32 1, %s1538_s10   ;;  %s1219_s8 = sshll.u32 %s1546_s12, 7 }
  0x18   : > { %s152_s23 = scalar_select %p151_p11, %s1546_s12, 1  ;;  %1341 = vset.pattern.permute.xlu0 %v1557_v2 }
  0x19   : > { %163 = vperm.xlu0 %1341, %v157_v1   ;;  %s1173_s7 = sshll.u32 %s148_s6, 3  ;;  %s1082_s24 = scalar_lea.sflag [#allocation4], %s148_s6 }
  0x1a   : > { %s1218_s26 = sshll.u32 %s152_s23, 3  ;;  %s150_s15 = scalar_lea.vmem [#allocation3], %s1173_s7 }
  0x1b   : > { %s1639_s29 = scalar_lea.vmem %s2035_s0, %s1218_s26  ;;  %s1098_s16 = sshll.u32 %s150_s15, 4  ;;  %s1990_s16 = int_to_ptr.vmem [resolvable:$true] %s1098_s16 }
  0x1c   : > { %v160_v3 = vld [vmem:[%s1639_s29] sm:$0xff]  ;;  %s1988_s23 = scalar_lea.hbm %s2037_s2, %s1219_s8  ;;  %s1476_s25 = scalar_lea.vmem %s1990_s16, 128 }
  0x1d   : > { %v177_v5 = vcombine.high %v160_v3, %v160_v3  ;;  %168 = vperm.xlu0 %1341, %v158_v4   ;;  %p1477_p12 = scmp.ne.s32.totalorder %s1990_s16, %s1476_s25  ;;  %s1558_s12 = smov [#allocation3]  }
  0x1e   : > { %s1480_s26 = sshll.u32 %s1558_s12, 4  ;;  %s1481_s26 = int_to_ptr.vmem [resolvable:$false] %s1480_s26 }
  0x1f   : > { %1176 = vmatprep.subr.msk.mxu0 %vm185_vm0, %v177_v5  ;;  %p1478_p13 = pnand %p1477_p12, %p1614_p4  ;;  %s1482_s27 = scalar_lea.vmem %s1481_s26, 256 }
  0x20   : > { %1177 = vmatpush1.msk.msra.mxu0 %vm185_vm0, %v160_v3  ;;  %p1483_p1 = scmp.lt.s32.totalorder %s1990_s16, %s1481_s26  ;;  %p1484_p2 = scmp.lt.s32.totalorder %s1482_s27, %s1476_s25 }
  0x21   : > { %1178 = vmatmul.mubr.msk.f32.vlgmr.msra.gmra.mrb[0].mxu0 %vm178_vm1, %v157_v1  ;;  %p1479_p0 = pneg %p1478_p13 }
  0x22   : > { %260 = vmatprep.mubr.f32.mxu0 %v1556_v0  ;;  %p1485_p3 = por %p1484_p2, %p1483_p1 }
  0x24   : > { %p1486_p5 = pnand %p1485_p3, %p1479_p0 }
  0x25   : > { %1179 = vmatmul.mubr.msk.f32.gmra.mrb[2].mxu0 %vm178_vm1, %v158_v4 }
  0x26   : > { %266 = vmatprep.mubr.f32.mxu0 %v1556_v0 }
  0x29   : > { %1180 = vmatmul.mubr.msk.f32.gmra.mrb[4].mxu0 %vm178_vm1, %v1715_v48 }
  0x98   : > { %v164_v6 = vpop.permute.xlu0 %163 }
  0x9c   : > { %v169_v11 = vpop.permute.xlu0 %168 }
  0xf4   : > { %v256_v7 = vpop.f32.mrb[0].mxu0 }
  0xf5   : > { %v257_v8 = vadd.f32 %v256_v7, %v164_v6  ;;  %v258_v9 = vpop.f32.mrb[1].mxu0 }
  0xf6   : > { %v259_v10 = vadd.f32 %v258_v9, %v164_v6 }
  0xf7   : > { %286 = vxpose.xlu1.b32.start.end [1/1] (short) %v257_v8, 128 }
  0xf8   : > { %v262_v12 = vpop.f32.mrb[2].mxu0 }
  0xf9   : > { %v263_v13 = vadd.f32 %v262_v12, %v169_v11  ;;  %v264_v14 = vpop.f32.mrb[3].mxu0 }
  0xfa   : > { %v265_v15 = vadd.f32 %v264_v14, %v169_v11 }
  0xfc   : > { %447 = vmatprep.subr.mxu1 %v265_v15 }
  0xfd   : > { %448 = vmatpush1.msra.mxu1 %v263_v13 }
 0x134   : > { %318 = vxpose.xlu1.b32.start.end [1/1] (short) %v259_v10, 128 }
 0x177   : > { %v302_v16 = vpop.trf.xlu1 }
 0x178   : > { %1181 = vmatmul.mubr.msk.f32.vlgmr.msra.gmra.mrb[0].mxu1 %vm350_vm2, %v302_v16 }
 0x179   : > { %517 = vmatprep.mubr.f32.mxu1 %v1556_v0 }
 0x17b   : > { %v303_v17 = vpop.trf.xlu1 }
 0x17c   : > { %1182 = vmatmul.mubr.msk.f32.gmra.mrb[2].mxu1 %vm350_vm2, %v303_v17 }
 0x17d   : > { %523 = vmatprep.mubr.f32.mxu1 %v1556_v0 }
 0x17f   : > { %v304_v18 = vpop.trf.xlu1 }
 0x180   : > { %1183 = vmatmul.mubr.msk.f32.gmra.mrb[4].mxu1 %vm350_vm2, %v304_v18 }
 0x181   : > { %529 = vmatprep.mubr.f32.mxu1 %v1556_v0 }
 0x183   : > { %v305_v19 = vpop.trf.xlu1 }
 0x184   : > { %1184 = vmatmul.mubr.msk.f32.gmra.mrb[6].mxu1 %vm350_vm2, %v305_v19 }
 0x185   : > { %535 = vmatprep.mubr.f32.mxu1 %v1556_v0 }
 0x187   : > { %v306_v20 = vpop.trf.xlu1 }
 0x188   : > { %1185 = vmatmul.mubr.msk.f32.gmra.mrb[8].mxu1 %vm350_vm2, %v306_v20 }
 0x189   : > { %541 = vmatprep.mubr.f32.mxu1 %v1556_v0 }
 0x18b   : > { %v307_v21 = vpop.trf.xlu1 }
 0x18c   : > { %1186 = vmatmul.mubr.msk.f32.gmra.mrb[10].mxu1 %vm350_vm2, %v307_v21 }
 0x18d   : > { %547 = vmatprep.mubr.f32.mxu1 %v1556_v0 }
 0x18f   : > { %v308_v22 = vpop.trf.xlu1 }
 0x190   : > { %1187 = vmatmul.mubr.msk.f32.gmra.mrb[12].mxu1 %vm350_vm2, %v308_v22 }
 0x191   : > { %553 = vmatprep.mubr.f32.mxu1 %v1556_v0 }
 0x193   : > { %v309_v23 = vpop.trf.xlu1 }
 0x194   : > { %1188 = vmatmul.mubr.msk.f32.gmra.mrb[14].mxu1 %vm350_vm2, %v309_v23 }
 0x195   : > { %559 = vmatprep.mubr.f32.mxu1 %v1556_v0 }
 0x197   : > { %v310_v24 = vpop.trf.xlu1 }
 0x198   : > { %1189 = vmatmul.mubr.msk.f32.gmra.mrb[16].mxu1 %vm350_vm2, %v310_v24 }
 0x199   : > { %565 = vmatprep.mubr.f32.mxu1 %v1556_v0 }
 0x19b   : > { %v311_v25 = vpop.trf.xlu1 }
 0x19c   : > { %1190 = vmatmul.mubr.msk.f32.gmra.mrb[18].mxu1 %vm350_vm2, %v311_v25 }
 0x19d   : > { %571 = vmatprep.mubr.f32.mxu1 %v1556_v0 }
 0x19f   : > { %v312_v26 = vpop.trf.xlu1 }
 0x1a0   : > { %1191 = vmatmul.mubr.msk.f32.gmra.mrb[20].mxu1 %vm350_vm2, %v312_v26 }
 0x1a1   : > { %577 = vmatprep.mubr.f32.mxu1 %v1556_v0 }
 0x1a3   : > { %v313_v27 = vpop.trf.xlu1 }
 0x1a4   : > { %1192 = vmatmul.mubr.msk.f32.gmra.mrb[22].mxu1 %vm350_vm2, %v313_v27 }
 0x1a5   : > { %583 = vmatprep.mubr.f32.mxu1 %v1556_v0 }
 0x1a7   : > { %v314_v28 = vpop.trf.xlu1 }
 0x1a8   : > { %1193 = vmatmul.mubr.msk.f32.gmra.mrb[24].mxu1 %vm350_vm2, %v314_v28 }
 0x1a9   : > { %589 = vmatprep.mubr.f32.mxu1 %v1556_v0 }
 0x1ab   : > { %v315_v29 = vpop.trf.xlu1 }
 0x1ac   : > { %1194 = vmatmul.mubr.msk.f32.gmra.mrb[26].mxu1 %vm350_vm2, %v315_v29 }
 0x1ad   : > { %595 = vmatprep.mubr.f32.mxu1 %v1556_v0 }
 0x1af   : > { %v316_v30 = vpop.trf.xlu1 }
 0x1b0   : > { %1195 = vmatmul.mubr.msk.f32.gmra.mrb[28].mxu1 %vm350_vm2, %v316_v30 }
 0x1b1   : > { %601 = vmatprep.mubr.f32.mxu1 %v1556_v0 }
 0x1b3   : > { %v317_v31 = vpop.trf.xlu1 }
 0x1b4   : > { %1196 = vmatmul.mubr.msk.f32.gmra.mrb[30].mxu1 %vm350_vm2, %v317_v31 }
 0x1b5   : > { %607 = vmatprep.mubr.f32.mxu1 %v1556_v0 }
 0x1b7   : > { %v334_v32 = vpop.trf.xlu1 }
 0x1b8   : > { %1197 = vmatmul.mubr.msk.f32.gmra.mrb[32].mxu1 %vm350_vm2, %v334_v32 }
 0x1b9   : > { %613 = vmatprep.mubr.f32.mxu1 %v1556_v0 }
 0x1bb   : > { %v335_v33 = vpop.trf.xlu1 }
 0x1bc   : > { %1198 = vmatmul.mubr.msk.f32.gmra.mrb[34].mxu1 %vm350_vm2, %v335_v33 }
 0x1bd   : > { %619 = vmatprep.mubr.f32.mxu1 %v1556_v0 }
 0x1bf   : > { %v336_v34 = vpop.trf.xlu1 }
 0x1c0   : > { %1199 = vmatmul.mubr.msk.f32.gmra.mrb[36].mxu1 %vm350_vm2, %v336_v34 }
 0x1c1   : > { %625 = vmatprep.mubr.f32.mxu1 %v1556_v0 }
 0x1c3   : > { %v337_v35 = vpop.trf.xlu1 }
 0x1c4   : > { %1200 = vmatmul.mubr.msk.f32.gmra.mrb[38].mxu1 %vm350_vm2, %v337_v35 }
 0x1c5   : > { %631 = vmatprep.mubr.f32.mxu1 %v1556_v0 }
 0x1c7   : > { %v338_v36 = vpop.trf.xlu1 }
 0x1c8   : > { %1201 = vmatmul.mubr.msk.f32.gmra.mrb[40].mxu1 %vm350_vm2, %v338_v36 }
 0x1c9   : > { %637 = vmatprep.mubr.f32.mxu1 %v1556_v0 }
 0x1cb   : > { %v339_v37 = vpop.trf.xlu1 }
 0x1cc   : > { %1202 = vmatmul.mubr.msk.f32.gmra.mrb[42].mxu1 %vm350_vm2, %v339_v37 }
 0x1cd   : > { %643 = vmatprep.mubr.f32.mxu1 %v1556_v0 }
 0x1cf   : > { %v340_v38 = vpop.trf.xlu1 }
 0x1d0   : > { %1203 = vmatmul.mubr.msk.f32.gmra.mrb[44].mxu1 %vm350_vm2, %v340_v38 }
 0x1d1   : > { %649 = vmatprep.mubr.f32.mxu1 %v1556_v0 }
 0x1d3   : > { %v341_v39 = vpop.trf.xlu1 }
 0x1d4   : > { %1204 = vmatmul.mubr.msk.f32.gmra.mrb[46].mxu1 %vm350_vm2, %v341_v39 }
 0x1d5   : > { %655 = vmatprep.mubr.f32.mxu1 %v1556_v0 }
 0x1d7   : > { %v342_v40 = vpop.trf.xlu1 }
 0x1d8   : > { %1205 = vmatmul.mubr.msk.f32.gmra.mrb[48].mxu1 %vm350_vm2, %v342_v40 }
 0x1d9   : > { %661 = vmatprep.mubr.f32.mxu1 %v1556_v0 }
 0x1db   : > { %v343_v41 = vpop.trf.xlu1 }
 0x1dc   : > { %1206 = vmatmul.mubr.msk.f32.gmra.mrb[50].mxu1 %vm350_vm2, %v343_v41 }
 0x1dd   : > { %667 = vmatprep.mubr.f32.mxu1 %v1556_v0 }
 0x1df   : > { %v344_v42 = vpop.trf.xlu1 }
 0x1e0   : > { %1207 = vmatmul.mubr.msk.f32.gmra.mrb[52].mxu1 %vm350_vm2, %v344_v42 }
 0x1e1   : > { %673 = vmatprep.mubr.f32.mxu1 %v1556_v0 }
 0x1e3   : > { %v345_v43 = vpop.trf.xlu1 }
 0x1e4   : > { %1208 = vmatmul.mubr.msk.f32.gmra.mrb[54].mxu1 %vm350_vm2, %v345_v43 }
 0x1e5   : > { %679 = vmatprep.mubr.f32.mxu1 %v1556_v0 }
 0x1e7   : > { %v346_v44 = vpop.trf.xlu1 }
 0x1e8   : > { %1209 = vmatmul.mubr.msk.f32.gmra.mrb[56].mxu1 %vm350_vm2, %v346_v44 }
 0x1e9   : > { %685 = vmatprep.mubr.f32.mxu1 %v1556_v0 }
 0x1eb   : > { %v347_v45 = vpop.trf.xlu1 }
 0x1ec   : > { %1210 = vmatmul.mubr.msk.f32.gmra.mrb[58].mxu1 %vm350_vm2, %v347_v45 }
 0x1ed   : > { %691 = vmatprep.mubr.f32.mxu1 %v1556_v0 }
 0x1ef   : > { %v348_v46 = vpop.trf.xlu1 }
 0x1f0   : > { %1211 = vmatmul.mubr.msk.f32.gmra.mrb[60].mxu1 %vm350_vm2, %v348_v46 }
 0x1f1   : > { %697 = vmatprep.mubr.f32.mxu1 %v1556_v0 }
 0x1f3   : > { %v349_v47 = vpop.trf.xlu1 }
 0x1f4   : > { %1212 = vmatmul.mubr.msk.f32.gmra.mrb[62].mxu1 %vm350_vm2, %v349_v47 }
 0x24b   : > { %v1719_v49 = vpop.f32.mrb[0].mxu1 }
 0x24c   : > { %v1721_v50 = vpop.f32.mrb[1].mxu1 }
 0x24d   : > { %v704_v51 = vmax.f32 %v1719_v49, %v1721_v50 }
 0x24f   : > { %705 = vmax.xlane.f32.xlu0 %v704_v51  ;;  %v1725_v52 = vpop.f32.mrb[2].mxu1 }
 0x250   : > { %v1727_v53 = vpop.f32.mrb[3].mxu1 }
 0x251   : > { %v707_v54 = vmax.f32 %v1725_v52, %v1727_v53 }
 0x253   : > { %708 = vmax.xlane.f32.xlu0 %v707_v54  ;;  %v1731_v55 = vpop.f32.mrb[4].mxu1 }
 0x254   : > { %v1733_v56 = vpop.f32.mrb[5].mxu1 }
 0x255   : > { %v710_v57 = vmax.f32 %v1731_v55, %v1733_v56 }
 0x257   : > { %711 = vmax.xlane.f32.xlu0 %v710_v57  ;;  %v1737_v58 = vpop.f32.mrb[6].mxu1 }
 0x258   : > { %v1739_v59 = vpop.f32.mrb[7].mxu1 }
 0x259   : > { %v713_v60 = vmax.f32 %v1737_v58, %v1739_v59 }
 0x25b   : > { %714 = vmax.xlane.f32.xlu0 %v713_v60  ;;  %v1743_v61 = vpop.f32.mrb[8].mxu1 }
 0x25c   : > { %v1745_v62 = vpop.f32.mrb[9].mxu1 }
 0x25d   : > { %v716_v63 = vmax.f32 %v1743_v61, %v1745_v62 }
 0x25f   : > { %717 = vmax.xlane.f32.xlu0 %v716_v63  ;;  %v1749_v0 = vpop.f32.mrb[10].mxu1 }
 0x260   : > { %v1751_v1 = vpop.f32.mrb[11].mxu1 }
 0x261   : > { %v719_v2 = vmax.f32 %v1749_v0, %v1751_v1 }
 0x263   : > { %720 = vmax.xlane.f32.xlu0 %v719_v2  ;;  %v1755_v3 = vpop.f32.mrb[12].mxu1 }
 0x264   : > { %v1757_v4 = vpop.f32.mrb[13].mxu1 }
 0x265   : > { %v722_v5 = vmax.f32 %v1755_v3, %v1757_v4 }
 0x267   : > { %723 = vmax.xlane.f32.xlu0 %v722_v5  ;;  %v1761_v6 = vpop.f32.mrb[14].mxu1 }
 0x268   : > { %v1763_v7 = vpop.f32.mrb[15].mxu1 }
 0x269   : > { %v725_v8 = vmax.f32 %v1761_v6, %v1763_v7 }
 0x26b   : > { %726 = vmax.xlane.f32.xlu0 %v725_v8  ;;  %v1767_v9 = vpop.f32.mrb[16].mxu1 }
 0x26c   : > { %v1769_v10 = vpop.f32.mrb[17].mxu1 }
 0x26d   : > { %v728_v11 = vmax.f32 %v1767_v9, %v1769_v10 }
 0x26f   : > { %729 = vmax.xlane.f32.xlu1 %v728_v11  ;;  %v1773_v12 = vpop.f32.mrb[18].mxu1 }
 0x270   : > { %v1775_v13 = vpop.f32.mrb[19].mxu1 }
 0x271   : > { %v731_v14 = vmax.f32 %v1773_v12, %v1775_v13 }
 0x273   : > { %732 = vmax.xlane.f32.xlu0 %v731_v14  ;;  %v1779_v15 = vpop.f32.mrb[20].mxu1 }
 0x274   : > { %v1781_v16 = vpop.f32.mrb[21].mxu1 }
 0x275   : > { %v734_v17 = vmax.f32 %v1779_v15, %v1781_v16 }
 0x277   : > { %735 = vmax.xlane.f32.xlu0 %v734_v17  ;;  %v1785_v18 = vpop.f32.mrb[22].mxu1 }
 0x278   : > { %v1787_v19 = vpop.f32.mrb[23].mxu1 }
 0x279   : > { %v737_v20 = vmax.f32 %v1785_v18, %v1787_v19 }
 0x27b   : > { %738 = vmax.xlane.f32.xlu0 %v737_v20  ;;  %v1791_v21 = vpop.f32.mrb[24].mxu1 }
 0x27c   : > { %v1793_v22 = vpop.f32.mrb[25].mxu1 }
 0x27d   : > { %v740_v23 = vmax.f32 %v1791_v21, %v1793_v22 }
 0x27f   : > { %741 = vmax.xlane.f32.xlu0 %v740_v23  ;;  %v1797_v24 = vpop.f32.mrb[26].mxu1 }
 0x280   : > { %v1799_v25 = vpop.f32.mrb[27].mxu1 }
 0x281   : > { %v743_v26 = vmax.f32 %v1797_v24, %v1799_v25 }
 0x283   : > { %744 = vmax.xlane.f32.xlu0 %v743_v26  ;;  %v1803_v27 = vpop.f32.mrb[28].mxu1 }
 0x284   : > { %v1805_v28 = vpop.f32.mrb[29].mxu1 }
 0x285   : > { %v746_v29 = vmax.f32 %v1803_v27, %v1805_v28 }
 0x287   : > { %747 = vmax.xlane.f32.xlu0 %v746_v29  ;;  %v1809_v30 = vpop.f32.mrb[30].mxu1 }
 0x288   : > { %v1811_v31 = vpop.f32.mrb[31].mxu1 }
 0x289   : > { %v749_v32 = vmax.f32 %v1809_v30, %v1811_v31 }
 0x28b   : > { %750 = vmax.xlane.f32.xlu0 %v749_v32  ;;  %v1815_v33 = vpop.f32.mrb[32].mxu1 }
 0x28c   : > { %v1817_v34 = vpop.f32.mrb[33].mxu1 }
 0x28d   : > { %v752_v35 = vmax.f32 %v1815_v33, %v1817_v34 }
 0x28f   : > { %753 = vmax.xlane.f32.xlu0 %v752_v35  ;;  %v1821_v36 = vpop.f32.mrb[34].mxu1 }
 0x290   : > { %v1823_v37 = vpop.f32.mrb[35].mxu1 }
 0x291   : > { %v755_v38 = vmax.f32 %v1821_v36, %v1823_v37 }
 0x293   : > { %756 = vmax.xlane.f32.xlu0 %v755_v38  ;;  %v1827_v39 = vpop.f32.mrb[36].mxu1 }
 0x294   : > { %v1829_v40 = vpop.f32.mrb[37].mxu1 }
 0x295   : > { %v758_v41 = vmax.f32 %v1827_v39, %v1829_v40 }
 0x297   : > { %759 = vmax.xlane.f32.xlu0 %v758_v41  ;;  %v1833_v42 = vpop.f32.mrb[38].mxu1 }
 0x298   : > { %v1835_v43 = vpop.f32.mrb[39].mxu1 }
 0x299   : > { %v761_v44 = vmax.f32 %v1833_v42, %v1835_v43 }
 0x29b   : > { %762 = vmax.xlane.f32.xlu0 %v761_v44  ;;  %v1839_v45 = vpop.f32.mrb[40].mxu1 }
 0x29c   : > { %v1841_v46 = vpop.f32.mrb[41].mxu1 }
 0x29d   : > { %v764_v47 = vmax.f32 %v1839_v45, %v1841_v46 }
 0x29f   : > { %765 = vmax.xlane.f32.xlu0 %v764_v47  ;;  %v1845_v51 = vpop.f32.mrb[42].mxu1 }
 0x2a0   : > { %v1847_v54 = vpop.f32.mrb[43].mxu1 }
 0x2a1   : > { %v767_v57 = vmax.f32 %v1845_v51, %v1847_v54 }
 0x2a3   : > { %768 = vmax.xlane.f32.xlu0 %v767_v57  ;;  %v1851_v60 = vpop.f32.mrb[44].mxu1 }
 0x2a4   : > { %v1853_v63 = vpop.f32.mrb[45].mxu1 }
 0x2a5   : > { %v770_v2 = vmax.f32 %v1851_v60, %v1853_v63 }
 0x2a7   : > { %771 = vmax.xlane.f32.xlu0 %v770_v2  ;;  %v1857_v5 = vpop.f32.mrb[46].mxu1 }
 0x2a8   : > { %v1859_v8 = vpop.f32.mrb[47].mxu1 }
 0x2a9   : > { %v773_v11 = vmax.f32 %v1857_v5, %v1859_v8 }
 0x2ab   : > { %774 = vmax.xlane.f32.xlu0 %v773_v11  ;;  %v1863_v14 = vpop.f32.mrb[48].mxu1 }
 0x2ac   : > { %v1865_v17 = vpop.f32.mrb[49].mxu1 }
 0x2ad   : > { %v776_v20 = vmax.f32 %v1863_v14, %v1865_v17 }
 0x2af   : > { %777 = vmax.xlane.f32.xlu0 %v776_v20  ;;  %v1869_v23 = vpop.f32.mrb[50].mxu1 }
 0x2b0   : > { %2053 = vst [vmem:[#allocation6_spill] sm:$0xff] %v1869_v23  ;;  %v1871_v26 = vpop.f32.mrb[51].mxu1 }
 0x2b1   : > { %2054 = vst [vmem:[#allocation7_spill] sm:$0xff] %v1871_v26  ;;  %v779_v29 = vmax.f32 %v1869_v23, %v1871_v26 }
 0x2b3   : > { %780 = vmax.xlane.f32.xlu0 %v779_v29  ;;  %v1875_v32 = vpop.f32.mrb[52].mxu1 }
 0x2b4   : > { %2055 = vst [vmem:[#allocation8_spill] sm:$0xff] %v1875_v32  ;;  %v1877_v35 = vpop.f32.mrb[53].mxu1 }
 0x2b5   : > { %2056 = vst [vmem:[#allocation9_spill] sm:$0xff] %v1877_v35  ;;  %v782_v38 = vmax.f32 %v1875_v32, %v1877_v35  ;;  %v1913_v32 = vpop.f32.mrb[4].mxu0 }
 0x2b7   : > { %783 = vmax.xlane.f32.xlu0 %v782_v38  ;;  %v1881_v41 = vpop.f32.mrb[54].mxu1 }
 0x2b8   : > { %2057 = vst [vmem:[#allocation10_spill] sm:$0xff] %v1881_v41  ;;  %v1883_v44 = vpop.f32.mrb[55].mxu1 }
 0x2b9   : > { %2058 = vst [vmem:[#allocation11_spill] sm:$0xff] %v1883_v44  ;;  %v785_v47 = vmax.f32 %v1881_v41, %v1883_v44 }
 0x2bb   : > { %786 = vmax.xlane.f32.xlu0 %v785_v47  ;;  %v1887_v57 = vpop.f32.mrb[56].mxu1 }
 0x2bc   : > { %2059 = vst [vmem:[#allocation12_spill] sm:$0xff] %v1887_v57  ;;  %v1889_v2 = vpop.f32.mrb[57].mxu1 }
 0x2bd   : > { %2060 = vst [vmem:[#allocation13_spill] sm:$0xff] %v1889_v2  ;;  %v788_v11 = vmax.f32 %v1887_v57, %v1889_v2 }
 0x2bf   : > { %789 = vmax.xlane.f32.xlu0 %v788_v11  ;;  %v1893_v20 = vpop.f32.mrb[58].mxu1 }
 0x2c0   : > { %2061 = vst [vmem:[#allocation14_spill] sm:$0xff] %v1893_v20  ;;  %v1895_v29 = vpop.f32.mrb[59].mxu1 }
 0x2c1   : > { %2062 = vst [vmem:[#allocation15_spill] sm:$0xff] %v1895_v29  ;;  %v791_v38 = vmax.f32 %v1893_v20, %v1895_v29 }
 0x2c3   : > { %792 = vmax.xlane.f32.xlu0 %v791_v38  ;;  %v1899_v35 = vpop.f32.mrb[60].mxu1 }
 0x2c4   : > { %2063 = vst [vmem:[#allocation16_spill] sm:$0xff] %v1899_v35  ;;  %v1901_v44 = vpop.f32.mrb[61].mxu1 }
 0x2c5   : > { %2064 = vst [vmem:[#allocation17_spill] sm:$0xff] %v1901_v44  ;;  %v794_v47 = vmax.f32 %v1899_v35, %v1901_v44  ;;  %v1915_v44 = vpop.f32.mrb[5].mxu0 }
 0x2c6   : > { %2066 = vst [vmem:[#allocation19_spill] sm:$0xff] %v1915_v44 }
 0x2c7   : > { %795 = vmax.xlane.f32.xlu0 %v794_v47  ;;  %v1905_v41 = vpop.f32.mrb[62].mxu1 }
 0x2c8   : > { %v1907_v2 = vpop.f32.mrb[63].mxu1 }
 0x2c9   : > { %2065 = vst [vmem:[#allocation18_spill] sm:$0xff] %v1907_v2  ;;  %v797_v11 = vmax.f32 %v1905_v41, %v1907_v2 }
 0x2cb   : > { %798 = vmax.xlane.f32.xlu0 %v797_v11 }
 0x2dc   : > { %v706_v57 = vpop.xlane.xlu0 %705 }
 0x2dd   : > { %v800_v29 = vsub.f32 %v1719_v49, %v706_v57  ;;  %v801_v38 = vsub.f32 %v1721_v50, %v706_v57 }
 0x2df   : > { %v864_v20 = vmul.f32 1.442695, %v800_v29  ;;  %v866_v26 = vmul.f32 1.442695, %v801_v38 }
 0x2e0   : > { %v709_v23 = vpop.xlane.xlu0 %708 }
 0x2e1   : > { %v802_v47 = vsub.f32 %v1725_v52, %v709_v23  ;;  %v803_v35 = vsub.f32 %v1727_v53, %v709_v23  ;;  %173 = vperm.xlu0 %1341, %v1715_v48   ;;  %1343 = vpow2.f32 %v864_v20 }
 0x2e2   : > { %1345 = vpow2.f32 %v866_v26 }
 0x2e3   : > { %v868_v11 = vmul.f32 1.442695, %v802_v47  ;;  %v870_v2 = vmul.f32 1.442695, %v803_v35 }
 0x2e4   : > { %v712_v49 = vpop.xlane.xlu0 %711 }
 0x2e5   : > { %1347 = vpow2.f32 %v868_v11  ;;  %v804_v50 = vsub.f32 %v1731_v55, %v712_v49  ;;  %v805_v57 = vsub.f32 %v1733_v56, %v712_v49 }
 0x2e6   : > { %1349 = vpow2.f32 %v870_v2 }
 0x2e7   : > { %v872_v29 = vmul.f32 1.442695, %v804_v50  ;;  %v874_v38 = vmul.f32 1.442695, %v805_v57 }
 0x2e8   : > { %v715_v44 = vpop.xlane.xlu0 %714 }
 0x2e9   : > { %v806_v52 = vsub.f32 %v1737_v58, %v715_v44  ;;  %v807_v53 = vsub.f32 %v1739_v59, %v715_v44  ;;  %1351 = vpow2.f32 %v872_v29 }
 0x2ea   : > { %1353 = vpow2.f32 %v874_v38 }
 0x2eb   : > { %v876_v48 = vmul.f32 1.442695, %v806_v52  ;;  %v878_v23 = vmul.f32 1.442695, %v807_v53  ;;  %v1344_v26 = vpop.eup %1343 }
 0x2ec   : > { %v718_v35 = vpop.xlane.xlu0 %717  ;;  %v1346_v56 = vpop.eup %1345 }
 0x2ed   : > { %1355 = vpow2.f32 %v876_v48  ;;  %v808_v20 = vsub.f32 %v1743_v61, %v718_v35  ;;  %v809_v55 = vsub.f32 %v1745_v62, %v718_v35 }
 0x2ee   : > { %1357 = vpow2.f32 %v878_v23 }
 0x2ef   : > { %v1348_v2 = vpop.eup %1347  ;;  %v880_v47 = vmul.f32 1.442695, %v808_v20  ;;  %v882_v49 = vmul.f32 1.442695, %v809_v55 }
 0x2f0   : > { %v1350_v11 = vpop.eup %1349  ;;  %v721_v58 = vpop.xlane.xlu0 %720  ;;  %v1222_v50 = vpack.c.bf16 %v1348_v2, %v1344_v26 }
 0x2f1   : > { %v810_v59 = vsub.f32 %v1749_v0, %v721_v58  ;;  %v811_v44 = vsub.f32 %v1751_v1, %v721_v58  ;;  %v1220_v57 = vpack.c.bf16 %v1350_v11, %v1346_v56  ;;  %1359 = vpow2.f32 %v880_v47 }
 0x2f2   : > { %1361 = vpow2.f32 %v882_v49 }
 0x2f3   : > { %v884_v29 = vmul.f32 1.442695, %v810_v59  ;;  %v886_v38 = vmul.f32 1.442695, %v811_v44  ;;  %1221 = vmatprep.subr.bf16.mxu0 %v1220_v57  ;;  %v1352_v62 = vpop.eup %1351 }
 0x2f4   : > { %1223 = vmatpush1.bf16.xpose.msra.mxu0 %v1222_v50  ;;  %v724_v61 = vpop.xlane.xlu0 %723  ;;  %v1354_v48 = vpop.eup %1353 }
 0x2f5   : > { %1363 = vpow2.f32 %v884_v29  ;;  %v812_v52 = vsub.f32 %v1755_v3, %v724_v61  ;;  %v813_v53 = vsub.f32 %v1757_v4, %v724_v61 }
 0x2f6   : > { %1365 = vpow2.f32 %v886_v38 }
 0x2f7   : > { %v1356_v23 = vpop.eup %1355  ;;  %v888_v0 = vmul.f32 1.442695, %v812_v52  ;;  %v890_v1 = vmul.f32 1.442695, %v813_v53 }
 0x2f8   : > { %v1358_v35 = vpop.eup %1357  ;;  %v727_v26 = vpop.xlane.xlu0 %726  ;;  %v1226_v20 = vpack.c.bf16 %v1356_v23, %v1352_v62 }
 0x2f9   : > { %v814_v55 = vsub.f32 %v1761_v6, %v727_v26  ;;  %v815_v56 = vsub.f32 %v1763_v7, %v727_v26  ;;  %v1224_v2 = vpack.c.bf16 %v1358_v35, %v1354_v48  ;;  %1367 = vpow2.f32 %v888_v0 }
 0x2fa   : > { %1369 = vpow2.f32 %v890_v1 }
 0x2fb   : > { %v892_v47 = vmul.f32 1.442695, %v814_v55  ;;  %v894_v11 = vmul.f32 1.442695, %v815_v56  ;;  %1225 = vmatprep.subr.bf16.mxu0 %v1224_v2  ;;  %v1360_v4 = vpop.eup %1359 }
 0x2fc   : > { %1227 = vmatpush1.bf16.xpose.msra.mxu0 %v1226_v20  ;;  %v730_v3 = vpop.xlane.xlu1 %729  ;;  %v1362_v50 = vpop.eup %1361 }
 0x2fd   : > { %1371 = vpow2.f32 %v892_v47  ;;  %v816_v49 = vsub.f32 %v1767_v9, %v730_v3  ;;  %v817_v58 = vsub.f32 %v1769_v10, %v730_v3 }
 0x2fe   : > { %1373 = vpow2.f32 %v894_v11 }
 0x2ff   : > { %v1364_v59 = vpop.eup %1363  ;;  %v896_v6 = vmul.f32 1.442695, %v816_v49  ;;  %v898_v7 = vmul.f32 1.442695, %v817_v58 }
 0x300   : > { %v1366_v44 = vpop.eup %1365  ;;  %v733_v57 = vpop.xlane.xlu0 %732  ;;  %v1230_v29 = vpack.c.bf16 %v1364_v59, %v1360_v4 }
 0x301   : > { %v818_v38 = vsub.f32 %v1773_v12, %v733_v57  ;;  %v819_v61 = vsub.f32 %v1775_v13, %v733_v57  ;;  %v1228_v62 = vpack.c.bf16 %v1366_v44, %v1362_v50  ;;  %1375 = vpow2.f32 %v896_v6 }
 0x302   : > { %1377 = vpow2.f32 %v898_v7 }
 0x303   : > { %v900_v52 = vmul.f32 1.442695, %v818_v38  ;;  %v902_v53 = vmul.f32 1.442695, %v819_v61  ;;  %1229 = vmatprep.subr.bf16.mxu0 %v1228_v62  ;;  %v1368_v10 = vpop.eup %1367 }
 0x304   : > { %1231 = vmatpush1.bf16.xpose.msra.mxu0 %v1230_v29  ;;  %v736_v9 = vpop.xlane.xlu0 %735  ;;  %v1370_v0 = vpop.eup %1369 }
 0x305   : > { %1379 = vpow2.f32 %v900_v52  ;;  %v820_v48 = vsub.f32 %v1779_v15, %v736_v9  ;;  %v821_v23 = vsub.f32 %v1781_v16, %v736_v9 }
 0x306   : > { %1381 = vpow2.f32 %v902_v53 }
 0x307   : > { %v1372_v35 = vpop.eup %1371  ;;  %v904_v12 = vmul.f32 1.442695, %v820_v48  ;;  %v906_v13 = vmul.f32 1.442695, %v821_v23 }
 0x308   : > { %v1374_v1 = vpop.eup %1373  ;;  %v739_v26 = vpop.xlane.xlu0 %738  ;;  %v1234_v20 = vpack.c.bf16 %v1372_v35, %v1368_v10 }
 0x309   : > { %v822_v55 = vsub.f32 %v1785_v18, %v739_v26  ;;  %v823_v56 = vsub.f32 %v1787_v19, %v739_v26  ;;  %v1232_v2 = vpack.c.bf16 %v1374_v1, %v1370_v0  ;;  %1383 = vpow2.f32 %v904_v12 }
 0x30a   : > { %1385 = vpow2.f32 %v906_v13 }
 0x30b   : > { %v908_v47 = vmul.f32 1.442695, %v822_v55  ;;  %v910_v11 = vmul.f32 1.442695, %v823_v56  ;;  %1233 = vmatprep.subr.bf16.mxu0 %v1232_v2  ;;  %v1376_v16 = vpop.eup %1375 }
 0x30c   : > { %1235 = vmatpush1.bf16.xpose.msra.mxu0 %v1234_v20  ;;  %v742_v15 = vpop.xlane.xlu0 %741  ;;  %v1378_v49 = vpop.eup %1377 }
 0x30d   : > { %1387 = vpow2.f32 %v908_v47  ;;  %v824_v3 = vsub.f32 %v1791_v21, %v742_v15  ;;  %v825_v4 = vsub.f32 %v1793_v22, %v742_v15 }
 0x30e   : > { %1389 = vpow2.f32 %v910_v11 }
 0x30f   : > { %v1380_v58 = vpop.eup %1379  ;;  %v912_v18 = vmul.f32 1.442695, %v824_v3  ;;  %v914_v19 = vmul.f32 1.442695, %v825_v4 }
 0x310   : > { %v1382_v50 = vpop.eup %1381  ;;  %v745_v59 = vpop.xlane.xlu0 %744  ;;  %v1238_v6 = vpack.c.bf16 %v1380_v58, %v1376_v16 }
 0x311   : > { %v826_v44 = vsub.f32 %v1797_v24, %v745_v59  ;;  %v827_v7 = vsub.f32 %v1799_v25, %v745_v59  ;;  %v1236_v57 = vpack.c.bf16 %v1382_v50, %v1378_v49  ;;  %1391 = vpow2.f32 %v912_v18 }
 0x312   : > { %1393 = vpow2.f32 %v914_v19 }
 0x313   : > { %v916_v29 = vmul.f32 1.442695, %v826_v44  ;;  %v918_v38 = vmul.f32 1.442695, %v827_v7  ;;  %1237 = vmatprep.subr.bf16.mxu0 %v1236_v57  ;;  %v1384_v22 = vpop.eup %1383 }
 0x314   : > { %1239 = vmatpush1.bf16.xpose.msra.mxu0 %v1238_v6  ;;  %v748_v21 = vpop.xlane.xlu0 %747  ;;  %v1386_v52 = vpop.eup %1385 }
 0x315   : > { %1395 = vpow2.f32 %v916_v29  ;;  %v828_v61 = vsub.f32 %v1803_v27, %v748_v21  ;;  %v829_v62 = vsub.f32 %v1805_v28, %v748_v21 }
 0x316   : > { %1397 = vpow2.f32 %v918_v38 }
 0x317   : > { %v1388_v53 = vpop.eup %1387  ;;  %v920_v24 = vmul.f32 1.442695, %v828_v61  ;;  %v922_v25 = vmul.f32 1.442695, %v829_v62 }
 0x318   : > { %v1390_v9 = vpop.eup %1389  ;;  %v751_v10 = vpop.xlane.xlu0 %750  ;;  %v1242_v48 = vpack.c.bf16 %v1388_v53, %v1384_v22 }
 0x319   : > { %v830_v23 = vsub.f32 %v1809_v30, %v751_v10  ;;  %v831_v0 = vsub.f32 %v1811_v31, %v751_v10  ;;  %v1240_v35 = vpack.c.bf16 %v1390_v9, %v1386_v52  ;;  %1399 = vpow2.f32 %v920_v24 }
 0x31a   : > { %1401 = vpow2.f32 %v922_v25 }
 0x31b   : > { %v924_v12 = vmul.f32 1.442695, %v830_v23  ;;  %v926_v1 = vmul.f32 1.442695, %v831_v0  ;;  %1241 = vmatprep.subr.bf16.mxu0 %v1240_v35  ;;  %v1392_v28 = vpop.eup %1391 }
 0x31c   : > { %1243 = vmatpush1.bf16.xpose.msra.mxu0 %v1242_v48  ;;  %v754_v27 = vpop.xlane.xlu0 %753  ;;  %v1394_v20 = vpop.eup %1393 }
 0x31d   : > { %1403 = vpow2.f32 %v924_v12  ;;  %v832_v13 = vsub.f32 %v1815_v33, %v754_v27  ;;  %v833_v26 = vsub.f32 %v1817_v34, %v754_v27 }
 0x31e   : > { %1405 = vpow2.f32 %v926_v1 }
 0x31f   : > { %v1396_v55 = vpop.eup %1395  ;;  %v928_v30 = vmul.f32 1.442695, %v832_v13  ;;  %v930_v31 = vmul.f32 1.442695, %v833_v26 }
 0x320   : > { %v1398_v56 = vpop.eup %1397  ;;  %v757_v2 = vpop.xlane.xlu0 %756  ;;  %v1246_v47 = vpack.c.bf16 %v1396_v55, %v1392_v28 }
 0x321   : > { %v834_v11 = vsub.f32 %v1821_v36, %v757_v2  ;;  %v835_v15 = vsub.f32 %v1823_v37, %v757_v2  ;;  %v1244_v16 = vpack.c.bf16 %v1398_v56, %v1394_v20  ;;  %1407 = vpow2.f32 %v928_v30 }
 0x322   : > { %1409 = vpow2.f32 %v930_v31 }
 0x323   : > { %v932_v3 = vmul.f32 1.442695, %v834_v11  ;;  %v934_v4 = vmul.f32 1.442695, %v835_v15  ;;  %1245 = vmatprep.subr.bf16.mxu0 %v1244_v16  ;;  %v1400_v34 = vpop.eup %1399 }
 0x324   : > { %1247 = vmatpush1.bf16.xpose.msra.mxu0 %v1246_v47  ;;  %v760_v33 = vpop.xlane.xlu0 %759  ;;  %v1402_v18 = vpop.eup %1401 }
 0x325   : > { %1411 = vpow2.f32 %v932_v3  ;;  %v836_v49 = vsub.f32 %v1827_v39, %v760_v33  ;;  %v837_v58 = vsub.f32 %v1829_v40, %v760_v33 }
 0x326   : > { %1413 = vpow2.f32 %v934_v4  ;;  %v2067_v4 = vld [vmem:[#allocation6_spill] sm:$0xff] }
 0x327   : > { %v1404_v50 = vpop.eup %1403  ;;  %v936_v36 = vmul.f32 1.442695, %v836_v49  ;;  %v938_v37 = vmul.f32 1.442695, %v837_v58 }
 0x328   : > { %v1406_v19 = vpop.eup %1405  ;;  %v763_v59 = vpop.xlane.xlu0 %762  ;;  %v1250_v6 = vpack.c.bf16 %v1404_v50, %v1400_v34  ;;  %v2068_v34 = vld [vmem:[#allocation7_spill] sm:$0xff] }
 0x329   : > { %v838_v44 = vsub.f32 %v1833_v42, %v763_v59  ;;  %v839_v7 = vsub.f32 %v1835_v43, %v763_v59  ;;  %v1248_v57 = vpack.c.bf16 %v1406_v19, %v1402_v18  ;;  %1415 = vpow2.f32 %v936_v36  ;;  %v2069_v36 = vld [vmem:[#allocation8_spill] sm:$0xff] }
 0x32a   : > { %1417 = vpow2.f32 %v938_v37  ;;  %v2070_v37 = vld [vmem:[#allocation9_spill] sm:$0xff] }
 0x32b   : > { %v940_v29 = vmul.f32 1.442695, %v838_v44  ;;  %v942_v38 = vmul.f32 1.442695, %v839_v7  ;;  %1249 = vmatprep.subr.bf16.mxu0 %v1248_v57  ;;  %v1408_v40 = vpop.eup %1407 }
 0x32c   : > { %1251 = vmatpush1.bf16.xpose.msra.mxu0 %v1250_v6  ;;  %v766_v39 = vpop.xlane.xlu0 %765  ;;  %v1410_v61 = vpop.eup %1409 }
 0x32d   : > { %1419 = vpow2.f32 %v940_v29  ;;  %v840_v21 = vsub.f32 %v1839_v45, %v766_v39  ;;  %v841_v22 = vsub.f32 %v1841_v46, %v766_v39 }
 0x32e   : > { %1421 = vpow2.f32 %v942_v38 }
 0x32f   : > { %v1412_v62 = vpop.eup %1411  ;;  %v944_v42 = vmul.f32 1.442695, %v840_v21  ;;  %v946_v43 = vmul.f32 1.442695, %v841_v22  ;;  %v2072_v22 = vld [vmem:[#allocation11_spill] sm:$0xff] }
 0x330   : > { %v1414_v52 = vpop.eup %1413  ;;  %v769_v53 = vpop.xlane.xlu0 %768  ;;  %v1254_v24 = vpack.c.bf16 %v1412_v62, %v1408_v40  ;;  %v2071_v40 = vld [vmem:[#allocation10_spill] sm:$0xff] }
 0x331   : > { %v842_v9 = vsub.f32 %v1845_v51, %v769_v53  ;;  %v843_v25 = vsub.f32 %v1847_v54, %v769_v53  ;;  %v1252_v10 = vpack.c.bf16 %v1414_v52, %v1410_v61  ;;  %1423 = vpow2.f32 %v944_v42 }
 0x332   : > { %1425 = vpow2.f32 %v946_v43 }
 0x333   : > { %v948_v48 = vmul.f32 1.442695, %v842_v9  ;;  %v950_v23 = vmul.f32 1.442695, %v843_v25  ;;  %1253 = vmatprep.subr.bf16.mxu0 %v1252_v10  ;;  %v1416_v46 = vpop.eup %1415  ;;  %v2074_v25 = vld [vmem:[#allocation13_spill] sm:$0xff] }
 0x334   : > { %1255 = vmatpush1.bf16.xpose.msra.mxu0 %v1254_v24  ;;  %v772_v45 = vpop.xlane.xlu0 %771  ;;  %v1418_v12 = vpop.eup %1417  ;;  %v2073_v24 = vld [vmem:[#allocation12_spill] sm:$0xff] }
 0x335   : > { %1427 = vpow2.f32 %v948_v48  ;;  %v844_v0 = vsub.f32 %v1851_v60, %v772_v45  ;;  %v845_v35 = vsub.f32 %v1853_v63, %v772_v45 }
 0x336   : > { %1429 = vpow2.f32 %v950_v23 }
 0x337   : > { %v1420_v1 = vpop.eup %1419  ;;  %v952_v51 = vmul.f32 1.442695, %v844_v0  ;;  %v954_v54 = vmul.f32 1.442695, %v845_v35 }
 0x338   : > { %v1422_v27 = vpop.eup %1421  ;;  %v775_v28 = vpop.xlane.xlu0 %774  ;;  %v1258_v13 = vpack.c.bf16 %v1420_v1, %v1416_v46  ;;  %v2075_v1 = vld [vmem:[#allocation14_spill] sm:$0xff] }
 0x339   : > { %v846_v26 = vsub.f32 %v1857_v5, %v775_v28  ;;  %v847_v20 = vsub.f32 %v1859_v8, %v775_v28  ;;  %v1256_v55 = vpack.c.bf16 %v1422_v27, %v1418_v12  ;;  %1431 = vpow2.f32 %v952_v51  ;;  %v2076_v27 = vld [vmem:[#allocation15_spill] sm:$0xff] }
 0x33a   : > { %1433 = vpow2.f32 %v954_v54 }
 0x33b   : > { %v956_v30 = vmul.f32 1.442695, %v846_v26  ;;  %v958_v56 = vmul.f32 1.442695, %v847_v20  ;;  %1257 = vmatprep.subr.bf16.mxu0 %v1256_v55  ;;  %v1424_v63 = vpop.eup %1423 }
 0x33c   : > { %1259 = vmatpush1.bf16.xpose.msra.mxu0 %v1258_v13  ;;  %v778_v60 = vpop.xlane.xlu0 %777  ;;  %v1426_v47 = vpop.eup %1425 }
 0x33d   : > { %1435 = vpow2.f32 %v956_v30  ;;  %v848_v31 = vsub.f32 %v1863_v14, %v778_v60  ;;  %v849_v2 = vsub.f32 %v1865_v17, %v778_v60  ;;  %v2077_v30 = vld [vmem:[#allocation16_spill] sm:$0xff]  ;;  %v2078_v60 = vld [vmem:[#allocation17_spill] sm:$0xff] }
 0x33e   : > { %1437 = vpow2.f32 %v958_v56 }
 0x33f   : > { %v1428_v11 = vpop.eup %1427  ;;  %v960_v5 = vmul.f32 1.442695, %v848_v31  ;;  %v962_v8 = vmul.f32 1.442695, %v849_v2 }
 0x340   : > { %v1430_v15 = vpop.eup %1429  ;;  %v781_v16 = vpop.xlane.xlu0 %780  ;;  %v1262_v3 = vpack.c.bf16 %v1428_v11, %v1424_v63 }
 0x341   : > { %v850_v33 = vsub.f32 %v2067_v4, %v781_v16  ;;  %v851_v49 = vsub.f32 %v2068_v34, %v781_v16  ;;  %v1260_v58 = vpack.c.bf16 %v1430_v15, %v1426_v47  ;;  %1439 = vpow2.f32 %v960_v5 }
 0x342   : > { %1441 = vpow2.f32 %v962_v8 }
 0x343   : > { %v964_v18 = vmul.f32 1.442695, %v850_v33  ;;  %v966_v50 = vmul.f32 1.442695, %v851_v49  ;;  %1261 = vmatprep.subr.bf16.mxu0 %v1260_v58  ;;  %v1432_v17 = vpop.eup %1431 }
 0x344   : > { %1263 = vmatpush1.bf16.xpose.msra.mxu0 %v1262_v3  ;;  %v784_v14 = vpop.xlane.xlu0 %783  ;;  %v1434_v6 = vpop.eup %1433  ;;  %v2079_v3 = vld [vmem:[#allocation18_spill] sm:$0xff] }
 0x345   : > { %1443 = vpow2.f32 %v964_v18  ;;  %v852_v19 = vsub.f32 %v2069_v36, %v784_v14  ;;  %v853_v59 = vsub.f32 %v2070_v37, %v784_v14 }
 0x346   : > { %1445 = vpow2.f32 %v966_v50 }
 0x347   : > { %v1436_v44 = vpop.eup %1435  ;;  %v968_v7 = vmul.f32 1.442695, %v852_v19  ;;  %v970_v29 = vmul.f32 1.442695, %v853_v59 }
 0x348   : > { %v1438_v57 = vpop.eup %1437  ;;  %v787_v38 = vpop.xlane.xlu0 %786  ;;  %v1266_v39 = vpack.c.bf16 %v1436_v44, %v1432_v17 }
 0x349   : > { %v854_v21 = vsub.f32 %v2071_v40, %v787_v38  ;;  %v855_v61 = vsub.f32 %v2072_v22, %v787_v38  ;;  %v1264_v62 = vpack.c.bf16 %v1438_v57, %v1434_v6  ;;  %1447 = vpow2.f32 %v968_v7 }
 0x34a   : > { %1449 = vpow2.f32 %v970_v29 }
 0x34b   : > { %v972_v42 = vmul.f32 1.442695, %v854_v21  ;;  %v974_v52 = vmul.f32 1.442695, %v855_v61  ;;  %1265 = vmatprep.subr.bf16.mxu0 %v1264_v62  ;;  %v1440_v53 = vpop.eup %1439 }
 0x34c   : > { %1267 = vmatpush1.bf16.xpose.msra.mxu0 %v1266_v39  ;;  %v790_v43 = vpop.xlane.xlu0 %789  ;;  %v1442_v48 = vpop.eup %1441 }
 0x34d   : > { %1451 = vpow2.f32 %v972_v42  ;;  %v856_v9 = vsub.f32 %v2073_v24, %v790_v43  ;;  %v857_v10 = vsub.f32 %v2074_v25, %v790_v43 }
 0x34e   : > { %1453 = vpow2.f32 %v974_v52 }
 0x34f   : > { %v1444_v23 = vpop.eup %1443  ;;  %v976_v45 = vmul.f32 1.442695, %v856_v9  ;;  %v978_v0 = vmul.f32 1.442695, %v857_v10  ;;  %v1475_v10 = vld [vmem:[%s1639_s29] sm:$0xff] }
 0x350   : > { %v1446_v46 = vpop.eup %1445  ;;  %v793_v35 = vpop.xlane.xlu0 %792  ;;  %v1270_v12 = vpack.c.bf16 %v1444_v23, %v1440_v53 }
 0x351   : > { %v858_v51 = vsub.f32 %v2075_v1, %v793_v35  ;;  %v859_v54 = vsub.f32 %v2076_v27, %v793_v35  ;;  %v1268_v28 = vpack.c.bf16 %v1446_v46, %v1442_v48  ;;  %1455 = vpow2.f32 %v976_v45 }
 0x352   : > { %1457 = vpow2.f32 %v978_v0 }
 0x353   : > { %v980_v13 = vmul.f32 1.442695, %v858_v51  ;;  %v982_v26 = vmul.f32 1.442695, %v859_v54  ;;  %1269 = vmatprep.subr.bf16.mxu0 %v1268_v28  ;;  %v1448_v55 = vpop.eup %1447 }
 0x354   : > { %1271 = vmatpush1.bf16.xpose.msra.mxu0 %v1270_v12  ;;  %v796_v20 = vpop.xlane.xlu0 %795  ;;  %v1450_v31 = vpop.eup %1449 }
 0x355   : > { %1459 = vpow2.f32 %v980_v13  ;;  %v860_v56 = vsub.f32 %v2077_v30, %v796_v20  ;;  %v861_v63 = vsub.f32 %v2078_v60, %v796_v20 }
 0x356   : > { %1461 = vpow2.f32 %v982_v26 }
 0x357   : > { %v1452_v2 = vpop.eup %1451  ;;  %v984_v47 = vmul.f32 1.442695, %v860_v56  ;;  %v986_v5 = vmul.f32 1.442695, %v861_v63 }
 0x358   : > { %v1454_v11 = vpop.eup %1453  ;;  %v799_v15 = vpop.xlane.xlu0 %798  ;;  %v1274_v8 = vpack.c.bf16 %v1452_v2, %v1448_v55 }
 0x359   : > { %v862_v16 = vsub.f32 %v1905_v41, %v799_v15  ;;  %v863_v4 = vsub.f32 %v2079_v3, %v799_v15  ;;  %v1272_v33 = vpack.c.bf16 %v1454_v11, %v1450_v31  ;;  %1463 = vpow2.f32 %v984_v47  ;;  %v2080_v41 = vld [vmem:[#allocation19_spill] sm:$0xff] }
 0x35a   : > { %1465 = vpow2.f32 %v986_v5 }
 0x35b   : > { %v988_v34 = vmul.f32 1.442695, %v862_v16  ;;  %v990_v49 = vmul.f32 1.442695, %v863_v4  ;;  %1273 = vmatprep.subr.bf16.mxu0 %v1272_v33  ;;  %v1456_v58 = vpop.eup %1455 }
 0x35c   : > { %1275 = vmatpush1.bf16.xpose.msra.mxu0 %v1274_v8  ;;  %v1458_v18 = vpop.eup %1457 }
 0x35d   : > { %1467 = vpow2.f32 %v988_v34 }
 0x35e   : > { %1469 = vpow2.f32 %v990_v49 }
 0x35f   : > { %v1460_v50 = vpop.eup %1459 }
 0x360   : > { %v1462_v14 = vpop.eup %1461  ;;  %v174_v17 = vpop.permute.xlu0 %173  ;;  %v1278_v36 = vpack.c.bf16 %v1460_v50, %v1456_v58 }
 0x361   : > { %v269_v19 = vadd.f32 %v1913_v32, %v174_v17  ;;  %v271_v37 = vadd.f32 %v2080_v41, %v174_v17  ;;  %v1276_v59 = vpack.c.bf16 %v1462_v14, %v1458_v18  ;;  %v1063_v32 = vlaneseq }
 0x363   : > { %277 = vst [vmem:[#allocation2 + $0x20] sm:$0x1f] %v269_v19  ;;  %278 = vst [vmem:[#allocation2 + $0x28] sm:$0x1f] %v271_v37  ;;  %1277 = vmatprep.subr.bf16.mxu0 %v1276_v59  ;;  %v1464_v6 = vpop.eup %1463  ;;  %v1064_v21 = vshrl.u32 %v1063_v32, 7 }
 0x364   : > { %1279 = vmatpush1.bf16.xpose.msra.mxu0 %v1278_v36  ;;  %v1466_v44 = vpop.eup %1465 }
 0x365   : > { %v1065_v22 = vsub.s32 4, %v1064_v21 }
 0x367   : > { %v1468_v7 = vpop.eup %1467 }
 0x368   : > { %v1470_v57 = vpop.eup %1469  ;;  %v1282_v29 = vpack.c.bf16 %v1468_v7, %v1464_v6 }
 0x369   : > { %v1280_v38 = vpack.c.bf16 %v1470_v57, %v1466_v44 }
 0x36a   : > { %v284_v39 = vld [vmem:[#allocation2 + $0x28] sm:$0x1f]  ;;  %v283_v40 = vld [vmem:[#allocation2 + $0x20] sm:$0x1f] }
 0x36b   : > { %1281 = vmatprep.subr.bf16.mxu0 %v1280_v38  ;;  %1056 = vmatprep.mubr.f32.mxu0 %v284_v39 }
 0x36c   : > { %1283 = vmatpush1.bf16.xpose.msra.mxu0 %v1282_v29 }
 0x373   : > { %1057 = vmatmul.mubr.f32.vlgmr.msra.gmra.mrb[6].mxu0 %v283_v40 }
 0x446   : > { %v1058_v61 = vpop.f32.mrb[6].mxu0 }
 0x447   : > { %v1066_v62 = vrot.slane %v1058_v61, %v1065_v22  ;;  %v1060_v42 = vpop.f32.mrb[7].mxu0 }
 0x448   : > { %v1070_v52 = vrot.slane %v1060_v42, %v1065_v22 }
 0x449   : > { %1471 = vrcp.f32 %v1066_v62 }
 0x44a   : > { %1473 = vrcp.f32 %v1070_v52 }
 0x453   : > { %v1472_v43 = vpop.eup %1471 }
 0x454   : > { %v1474_v53 = vpop.eup %1473  ;;  %v1072_v24 = vmul.f32 %v1472_v43, %v1058_v61 }
 0x455   : > { %v1074_v9 = vmul.f32 %v1474_v53, %v1060_v42 }
 0x457   : > { %v1077_v25 = vcombine.low %v1072_v24, %v1074_v9 }
 0x459   : > { %v1079_v48 = vadd.f32 %v1475_v10, %v1077_v25 }
 0x45b   : > { %1080 = vst [vmem:[%s150_s15] sm:$0xff] %v1079_v48 }
 0x45c   : > { %1489 = shalt.err (!%p1486_p5)
}
 0x45d   : > { %s1490_s28 = scalar_lea.hbm %s1988_s23, 128  ;;  %s1494_s3 = scalar_lea.hbm %s2037_s2, 256 }
 0x45e   : > { %p1491_p6 = scmp.ne.s32.totalorder %s1988_s23, %s1490_s28  ;;  %p1495_p10 = scmp.lt.u32.totalorder %s1988_s23, %s2037_s2 }
 0x45f   : > { %p1496_p11 = scmp.lt.u32.totalorder %s1494_s3, %s1490_s28  ;;  %p1498_p13 = scmp.lt.u32.totalorder %s1490_s28, %s1988_s23 }
 0x460   : > { %p1492_p7 = pnand %p1491_p6, %p1614_p4 }
 0x461   : > { %p1497_p12 = por %p1496_p11, %p1495_p10 }
 0x462   : > { %p1493_p9 = pneg %p1492_p7 }
 0x463   : > { %p1499_p0 = por %p1498_p13, %p1497_p12 }
 0x465   : > { %p1500_p1 = pnand %p1499_p0, %p1493_p9 }
 0x467   : > { %1503 = shalt.err (!%p1500_p1)
}
 0x468   : > { %1284 = dma.vmem_to_hbm [thread:$0]  (%p1614_p4), %s1990_s16, 128, %s1988_s23, %s1082_s24  }
 0x469 PF: > { %p1290_p2 = scmp.ge.s32.totalorder %s1554_s14, 2  ;;  %s1110_s6 = sand.u32 1, %s1534_s9  }
 0x46a   : > { %s1111_s7 = scalar_lea.sflag [#allocation4], %s1110_s6 }
 0x46b   : > { %p1287_p3 = pnand %p1290_p2, %p1621_p8 }
 0x46d   : > { %1529 = dma.done.wait (!%p1287_p3), %s1111_s7, 128  }
 0x46e   : > { %1531 = vsyncadd (!%p1287_p3), %s1111_s7, 4294967168  ;;  %s15_s14 = sadd.s32 1, %s1554_s14   ;;  %s2081_s9 = smov %s1538_s10 }
 0x46f   : > { %p12_p5 = scmp.ge.s32.totalorder %s15_s14, 4   ;;  %s2082_s10 = smov %s1542_s11 }
 0x470   : > { %s2083_s11 = smov %s1627_s22  ;;  %s2084_s12 = smov %s1550_s13 }
 0x471   : > { %s2085_s13 = smov %s2087_s17  ;;  %14 = sbr.rel (!%p12_p5) target bundleno = 4 (0x4), region = 63 }
 0x478   :  { %1116 = vsyncpa [#allocation4], 1 }
 0x479   :  { %1118 = vsyncpa [#allocation4 + $0x1], 1 }

</bundles_post_ra>
